<compile_context>
chip_gen: v6e
topology: v6e:2x2x1
jax: 0.10.0
libtpu: 0.0.40
codegen_flags: <defaults>
</compile_context>

<pallas_src>
import functools

import jax
import jax.numpy as jnp
from jax import lax
from jax.experimental import pallas as pl
from jax.experimental.pallas import tpu as pltpu

EPS = 1e-6                      # torch LayerNorm(eps=1e-06) in this module
_VMEM_LIMIT = 32 * 1024 * 1024  # explicit, safe on v5e/v6e/v7x
_SQRT_HALF = 0.7071067811865476
_MAX_TILE_ROWS = 1024           # big row tiles; single grid step at toy sizes


# ----------------------------------------------------------------------------- kernels

def _erf_approx(z):
    # Abramowitz & Stegun 7.1.26 (|err| < 1.5e-7): exact-GELU without relying on a
    # lax.erf lowering — only VPU/EUP ops (abs, mul, add, exp, select).
    a1, a2, a3, a4, a5 = 0.254829592, -0.284496736, 1.421413741, -1.453152027, 1.061405429
    pp = 0.3275911
    sgn = jnp.where(z >= 0.0, 1.0, -1.0)
    az = jnp.abs(z)
    t = 1.0 / (1.0 + pp * az)
    poly = ((((a5 * t + a4) * t + a3) * t + a2) * t + a1) * t
    return sgn * (1.0 - poly * jnp.exp(-az * az))


def _normalize_f32(x, eps):
    # torch LayerNorm statistics (biased variance), no affine (affine is folded outside).
    mu = jnp.mean(x, axis=-1, keepdims=True)
    c = x - mu
    var = jnp.mean(c * c, axis=-1, keepdims=True)
    return c * lax.rsqrt(var + eps)


def _ln_linear_kernel(x_ref, w_ref, b_ref, o_ref, *, eps, gelu):
    # LayerNorm stats in f32, then MXU matmul against the gamma-folded weight.
    x = x_ref[...].astype(jnp.float32)
    xn = _normalize_f32(x, eps)
    y = jnp.dot(xn, w_ref[...], preferred_element_type=jnp.float32) + b_ref[...]
    if gelu:
        y = 0.5 * y * (1.0 + _erf_approx(y * _SQRT_HALF))
    o_ref[...] = y.astype(o_ref.dtype)


def _attn_body(q, k, v, scale):
    s = jnp.einsum('gnd,gmd->gnm', q * scale, k, preferred_element_type=jnp.float32)
    m = jnp.max(s, axis=-1, keepdims=True)
    p = jnp.exp(s - m)
    denom = jnp.sum(p, axis=-1, keepdims=True)
    ctx = jnp.einsum('gnm,gmd->gnd', p, v, preferred_element_type=jnp.float32)
    return ctx * pl.reciprocal(denom, approx=True)


def _attn_kernel(q_ref, k_ref, v_ref, o_ref, *, scale):
    o_ref[...] = _attn_body(q_ref[...].astype(jnp.float32),
                            k_ref[...].astype(jnp.float32),
                            v_ref[...].astype(jnp.float32), scale).astype(o_ref.dtype)


def _attn_lepe_kernel(q_ref, k_ref, v_ref, lepe_ref, o_ref, *, scale):
    ctx = _attn_body(q_ref[...].astype(jnp.float32),
                     k_ref[...].astype(jnp.float32),
                     v_ref[...].astype(jnp.float32), scale)
    o_ref[...] = (ctx + lepe_ref[...].astype(jnp.float32)).astype(o_ref.dtype)


def _blend_ffn1_kernel(ctx_ref, wo_ref, bo_ref, s_ref, r_ref, w1_ref, b1_ref,
                       scal_ref, x1_ref, h_ref, *, eps):
    # x1 = wa*s + wb*(ctx @ Wo^T + bo) + res  ;  h = GELU( LN(x1) @ W1^T + b1 )
    # wa/wb per stream live in SMEM, indexed by the stream grid axis.
    st = pl.program_id(0)
    wa = scal_ref[st, 0]
    wb = scal_ref[st, 1]
    proj = jnp.dot(ctx_ref[...].astype(jnp.float32), wo_ref[...],
                   preferred_element_type=jnp.float32) + bo_ref[...]
    x1 = wa * s_ref[...].astype(jnp.float32) + wb * proj + r_ref[...].astype(jnp.float32)
    x1_ref[...] = x1.astype(x1_ref.dtype)
    xn = _normalize_f32(x1, eps)
    h = jnp.dot(xn, w1_ref[...], preferred_element_type=jnp.float32) + b1_ref[...]
    h = 0.5 * h * (1.0 + _erf_approx(h * _SQRT_HALF))
    h_ref[...] = h.astype(h_ref.dtype)


def _ffn2_ln_kernel(h_ref, w2_ref, b2_ref, x1_ref, g_ref, b_ref, o_ref, *, eps):
    # out = LN_enc( h @ W2^T + b2 + x1 )
    t = (jnp.dot(h_ref[...].astype(jnp.float32), w2_ref[...],
                 preferred_element_type=jnp.float32)
         + b2_ref[...] + x1_ref[...].astype(jnp.float32))
    o_ref[...] = (_normalize_f32(t, eps) * g_ref[...] + b_ref[...]).astype(o_ref.dtype)


# ------------------------------------------------------------------------ tiling helpers

def _row_tiling(rows, max_tile=_MAX_TILE_ROWS):
    r8 = ((rows + 7) // 8) * 8
    tile = min(max_tile, r8)
    padded = ((rows + tile - 1) // tile) * tile
    return tile, padded


def _pad_rows3(a, padded):
    # a: (S, rows, F) -> pad rows axis to `padded`
    if a.shape[1] == padded:
        return a
    return jnp.pad(a, ((0, 0), (0, padded - a.shape[1]), (0, 0)))


# --------------------------------------------------------------------------- wrappers

def ln_linear_2s(x_stack, gammas, betas, Ws, bs, *, gelu=False, eps=EPS):
    """Fused LayerNorm + Linear for BOTH streams in one call.

    x_stack: (2, rows, C); Ws: (2, N, C) (torch layout); gammas/betas: (2, C); bs: (2, N).
    gamma/beta folded:  LN(x) @ W^T + b == normalize(x) @ (gamma*W^T) + (beta @ W^T + b).
    Output width padded to a multiple of 128 for lane-dense stores. Returns (2, rows, N).
    """
    S, rows, C = x_stack.shape
    N = Ws.shape[1]
    w_f = jnp.einsum('snc,sc->scn', Ws.astype(jnp.float32), gammas.astype(jnp.float32))
    b_f = (jnp.einsum('sc,snc->sn', betas.astype(jnp.float32), Ws.astype(jnp.float32))
           + bs.astype(jnp.float32))
    n_pad = ((N + 127) // 128) * 128
    if n_pad != N:
        w_f = jnp.pad(w_f, ((0, 0), (0, 0), (0, n_pad - N)))
        b_f = jnp.pad(b_f, ((0, 0), (0, n_pad - N)))
    b_f = b_f.reshape(S, 1, n_pad)

    tile, padded = _row_tiling(rows)
    xp = _pad_rows3(x_stack, padded)

    out = pl.pallas_call(
        functools.partial(_ln_linear_kernel, eps=eps, gelu=gelu),
        out_shape=jax.ShapeDtypeStruct((S, padded, n_pad), x_stack.dtype),
        grid_spec=pltpu.PrefetchScalarGridSpec(
            num_scalar_prefetch=0,
            grid=(S, padded // tile),
            in_specs=[
                pl.BlockSpec((None, tile, C), lambda s, i: (s, i, 0)),
                pl.BlockSpec((None, C, n_pad), lambda s, i: (s, 0, 0)),
                pl.BlockSpec((None, 1, n_pad), lambda s, i: (s, 0, 0)),
            ],
            out_specs=pl.BlockSpec((None, tile, n_pad), lambda s, i: (s, i, 0)),
        ),
        compiler_params=pltpu.CompilerParams(
            dimension_semantics=("parallel", "parallel"),
            vmem_limit_bytes=_VMEM_LIMIT),
    )(xp, w_f, b_f)
    return out[:, :rows, :N]


def attn_pallas(q, k, v, lepe=None, *, scale):
    """softmax(q*scale @ k^T) @ v (+ lepe) over groups g.  q/k/v: (G, N, D)."""
    G, N, D = q.shape
    score_bytes = N * N * 4
    gt = int(max(1, min(G, (4 * 1024 * 1024) // max(score_bytes, 1))))
    Gp = ((G + gt - 1) // gt) * gt

    def padg(a):
        return a if a.shape[0] == Gp else jnp.pad(a, ((0, Gp - G), (0, 0), (0, 0)))

    args = [padg(q), padg(k), padg(v)]
    specs = [pl.BlockSpec((gt, N, D), lambda i: (i, 0, 0))] * 3
    if lepe is not None:
        args.append(padg(lepe))
        specs.append(pl.BlockSpec((gt, N, D), lambda i: (i, 0, 0)))
        kernel = functools.partial(_attn_lepe_kernel, scale=scale)
    else:
        kernel = functools.partial(_attn_kernel, scale=scale)

    out = pl.pallas_call(
        kernel,
        out_shape=jax.ShapeDtypeStruct((Gp, N, D), q.dtype),
        grid_spec=pltpu.PrefetchScalarGridSpec(
            num_scalar_prefetch=0,
            grid=(Gp // gt,),
            in_specs=specs,
            out_specs=pl.BlockSpec((gt, N, D), lambda i: (i, 0, 0)),
        ),
        compiler_params=pltpu.CompilerParams(
            dimension_semantics=("parallel",),
            vmem_limit_bytes=_VMEM_LIMIT),
    )(*args)
    return out[:G]


def blend_ffn1_2s(ctx, Wo, bo, s_attn, res, scal, g1, b1ln, W1, b1, *, eps=EPS):
    """Out-proj + blend + residual + ffn_norm + fc1 + GELU, both streams in one call.

    ctx/s_attn/res: (2, rows, C); Wo: (2, C, C); W1: (2, 4C, C) (torch layout);
    scal: (2, 2) = [[w11,w12],[w21,w22]] (SMEM). Returns (x1, h): (2,rows,C), (2,rows,4C).
    """
    S, rows, C = ctx.shape
    Hd = W1.shape[1]
    wo_t = jnp.swapaxes(Wo.astype(jnp.float32), 1, 2)                       # (2, C, C)
    bo_r = bo.astype(jnp.float32).reshape(S, 1, C)
    w1_f = jnp.einsum('shc,sc->sch', W1.astype(jnp.float32), g1.astype(jnp.float32))
    b1_f = (jnp.einsum('sc,shc->sh', b1ln.astype(jnp.float32), W1.astype(jnp.float32))
            + b1.astype(jnp.float32)).reshape(S, 1, Hd)

    tile, padded = _row_tiling(rows)
    cp = _pad_rows3(ctx, padded)
    sp = _pad_rows3(s_attn, padded)
    rp = _pad_rows3(res, padded)

    x1, h = pl.pallas_call(
        functools.partial(_blend_ffn1_kernel, eps=eps),
        out_shape=(jax.ShapeDtypeStruct((S, padded, C), ctx.dtype),
                   jax.ShapeDtypeStruct((S, padded, Hd), ctx.dtype)),
        grid_spec=pltpu.PrefetchScalarGridSpec(
            num_scalar_prefetch=0,
            grid=(S, padded // tile),
            in_specs=[
                pl.BlockSpec((None, tile, C), lambda s, i: (s, i, 0)),   # ctx
                pl.BlockSpec((None, C, C), lambda s, i: (s, 0, 0)),      # Wo^T
                pl.BlockSpec((None, 1, C), lambda s, i: (s, 0, 0)),      # bo
                pl.BlockSpec((None, tile, C), lambda s, i: (s, i, 0)),   # windowed-attn out
                pl.BlockSpec((None, tile, C), lambda s, i: (s, i, 0)),   # residual
                pl.BlockSpec((None, C, Hd), lambda s, i: (s, 0, 0)),     # folded W1
                pl.BlockSpec((None, 1, Hd), lambda s, i: (s, 0, 0)),     # folded b1
                pl.BlockSpec(memory_space=pltpu.MemorySpace.SMEM),       # blend scalars
            ],
            out_specs=(
                pl.BlockSpec((None, tile, C), lambda s, i: (s, i, 0)),
                pl.BlockSpec((None, tile, Hd), lambda s, i: (s, i, 0)),
            ),
        ),
        compiler_params=pltpu.CompilerParams(
            dimension_semantics=("parallel", "parallel"),
            vmem_limit_bytes=_VMEM_LIMIT),
    )(cp, wo_t, bo_r, sp, rp, w1_f, b1_f, scal.astype(jnp.float32))
    return x1[:, :rows], h[:, :rows]


def ffn2_ln_2s(h, W2, b2, x1, g, b, *, eps=EPS):
    """fc2 + bias + residual + final encoder LayerNorm, both streams in one call.

    h: (2, rows, 4C); W2: (2, C, 4C) (torch layout); x1: (2, rows, C); g/b: (2, C).
    """
    S, rows, Hd = h.shape
    C = W2.shape[1]
    w2_t = jnp.swapaxes(W2.astype(jnp.float32), 1, 2)                       # (2, 4C, C)
    b2_r = b2.astype(jnp.float32).reshape(S, 1, C)
    g_r = g.astype(jnp.float32).reshape(S, 1, C)
    b_r = b.astype(jnp.float32).reshape(S, 1, C)

    tile, padded = _row_tiling(rows)
    hp = _pad_rows3(h, padded)
    x1p = _pad_rows3(x1, padded)

    out = pl.pallas_call(
        functools.partial(_ffn2_ln_kernel, eps=eps),
        out_shape=jax.ShapeDtypeStruct((S, padded, C), h.dtype),
        grid_spec=pltpu.PrefetchScalarGridSpec(
            num_scalar_prefetch=0,
            grid=(S, padded // tile),
            in_specs=[
                pl.BlockSpec((None, tile, Hd), lambda s, i: (s, i, 0)),
                pl.BlockSpec((None, Hd, C), lambda s, i: (s, 0, 0)),
                pl.BlockSpec((None, 1, C), lambda s, i: (s, 0, 0)),
                pl.BlockSpec((None, tile, C), lambda s, i: (s, i, 0)),
                pl.BlockSpec((None, 1, C), lambda s, i: (s, 0, 0)),
                pl.BlockSpec((None, 1, C), lambda s, i: (s, 0, 0)),
            ],
            out_specs=pl.BlockSpec((None, tile, C), lambda s, i: (s, i, 0)),
        ),
        compiler_params=pltpu.CompilerParams(
            dimension_semantics=("parallel", "parallel"),
            vmem_limit_bytes=_VMEM_LIMIT),
    )(hp, w2_t, b2_r, x1p, g_r, b_r)
    return out[:, :rows]


# ------------------------------------------------------------------ layout plumbing (JAX)

def im2cswin(t, H, W, H_sp, W_sp, nh):
    """(B, N, C) -> (B*nw, nh, H_sp*W_sp, C//nh); matches torch im2cswin / get_lepe value path."""
    B, _, C = t.shape
    hd = C // nh
    win = t.reshape(B, H // H_sp, H_sp, W // W_sp, W_sp, C).transpose(0, 1, 3, 2, 4, 5)
    win = win.reshape(-1, H_sp * W_sp, C)
    return win.reshape(-1, H_sp * W_sp, nh, hd).transpose(0, 2, 1, 3)


def windows2img(wins, H_sp, W_sp, H, W):
    B = wins.shape[0] // ((H // H_sp) * (W // W_sp))
    img = wins.reshape(B, H // H_sp, W // W_sp, H_sp, W_sp, -1)
    return img.transpose(0, 1, 3, 2, 4, 5).reshape(B, H, W, -1)


def depthwise_lepe(v, conv_w, conv_b, H, W, H_sp, W_sp, nh):
    """LePE positional term: 3x3 depthwise conv on window images of v.
    # TODO(synk): depthwise 3x3 conv is left to XLA (lax.conv) rather than a Pallas kernel.
    """
    B, _, C = v.shape
    hd = C // nh
    img = v.reshape(B, H // H_sp, H_sp, W // W_sp, W_sp, C).transpose(0, 1, 3, 2, 4, 5)
    img = img.reshape(-1, H_sp, W_sp, C)                               # NHWC windows
    kern = jnp.transpose(conv_w, (2, 3, 1, 0))                         # (3,3,1,C) HWIO
    out = lax.conv_general_dilated(
        img, kern, window_strides=(1, 1), padding='SAME',
        dimension_numbers=('NHWC', 'HWIO', 'NHWC'),
        feature_group_count=C) + conv_b
    Bw = out.shape[0]
    return out.reshape(Bw, H_sp * W_sp, nh, hd).transpose(0, 2, 1, 3)  # (Bw, nh, win, hd)


# ------------------------------------------------------------------------ module forward

def lepe_attention_pair(qx, ky, vy, qy, kx, vx, *, nh, resolution, split, conv_w, conv_b):
    """Both LePE windowed cross-attentions (idx=0 and idx=1) in ONE pallas_call."""
    B, L, C = qx.shape
    H = W = resolution
    hd = C // nh
    win = resolution * split                    # same total window size for both idx
    Hs0, Ws0 = resolution, split                # idx = 0
    Hs1, Ws1 = split, resolution                # idx = 1

    def groups(t, H_sp, W_sp):
        return im2cswin(t, H, W, H_sp, W_sp, nh).reshape(-1, H_sp * W_sp, hd)

    q0, k0, v0 = groups(qx, Hs0, Ws0), groups(ky, Hs0, Ws0), groups(vy, Hs0, Ws0)
    q1, k1, v1 = groups(qy, Hs1, Ws1), groups(kx, Hs1, Ws1), groups(vx, Hs1, Ws1)
    G = q0.shape[0]

    # idx=0: torch computes the conv but never adds it -> zero bias; idx=1: depthwise LePE.
    lepe1 = depthwise_lepe(vx, conv_w, conv_b, H, W, Hs1, Ws1, nh).reshape(G, win, hd)
    lepe = jnp.concatenate([jnp.zeros_like(lepe1), lepe1], axis=0)

    out = attn_pallas(jnp.concatenate([q0, q1], 0),
                      jnp.concatenate([k0, k1], 0),
                      jnp.concatenate([v0, v1], 0),
                      lepe, scale=hd ** -0.5)

    def back(o, H_sp, W_sp):
        Bw = o.shape[0] // nh
        o = o.reshape(Bw, nh, H_sp * W_sp, hd).transpose(0, 2, 1, 3).reshape(Bw, H_sp * W_sp, C)
        return windows2img(o, H_sp, W_sp, H, W).reshape(B, H * W, C)

    return back(out[:G], Hs0, Ws0), back(out[G:], Hs1, Ws1)


def global_attention_pair(qx, ky, vy, qy, kx, vx, *, nh):
    """Both global multi-head cross-attentions in ONE pallas_call."""
    B, L, C = qx.shape
    hd = C // nh

    def heads(t):
        return t.reshape(B, L, nh, hd).transpose(0, 2, 1, 3).reshape(B * nh, L, hd)

    G = B * nh
    ctx = attn_pallas(jnp.concatenate([heads(qx), heads(qy)], 0),
                      jnp.concatenate([heads(ky), heads(kx)], 0),
                      jnp.concatenate([heads(vy), heads(vx)], 0),
                      scale=hd ** -0.5)

    def merge(c):
        return c.reshape(B, nh, L, hd).transpose(0, 2, 1, 3).reshape(B * L, C)

    return merge(ctx[:G]), merge(ctx[G:])


def encoder_pallas(p, x, y, *, resolution, split, nh_lepe, nh_global):
    # NOTE: dropout layers (attn/proj/MLP) are identity in eval mode and are omitted.
    B, L, C = x.shape
    rows = B * L
    x2 = x.reshape(rows, C)
    y2 = y.reshape(rows, C)
    xy = jnp.stack([x2, y2], axis=0)                                    # (2, rows, C)

    # attention pre-norms fused with the three QKV projections, both streams in one call
    Wqkv = jnp.stack([jnp.concatenate([p['Wq'], p['Wk'], p['Wv']], 0),
                      jnp.concatenate([p['Wqd'], p['Wkd'], p['Wvd']], 0)], 0)
    bqkv = jnp.stack([jnp.concatenate([p['bq'], p['bk'], p['bv']], 0),
                      jnp.concatenate([p['bqd'], p['bkd'], p['bvd']], 0)], 0)
    gammas = jnp.stack([p['ln_attn_g'], p['ln_attnd_g']], 0)
    betas = jnp.stack([p['ln_attn_b'], p['ln_attnd_b']], 0)
    qkv = ln_linear_2s(xy, gammas, betas, Wqkv, bqkv)                   # (2, rows, 3C)
    qx3, kx3, vx3 = (qkv[0, :, i * C:(i + 1) * C].reshape(B, L, C) for i in range(3))
    qy3, ky3, vy3 = (qkv[1, :, i * C:(i + 1) * C].reshape(B, L, C) for i in range(3))

    # windowed LePE cross attentions (merged) and global cross attentions (merged)
    sx, sy = lepe_attention_pair(qx3, ky3, vy3, qy3, kx3, vx3,
                                 nh=nh_lepe, resolution=resolution, split=split,
                                 conv_w=p['conv_w'], conv_b=p['conv_b'])
    cx, cy = global_attention_pair(qx3, ky3, vy3, qy3, kx3, vx3, nh=nh_global)

    # out projection + blend + residual + ffn_norm + fc1 + GELU (both streams, one call)
    ctx = jnp.stack([cx, cy], 0)
    s_attn = jnp.stack([sx.reshape(rows, C), sy.reshape(rows, C)], 0)
    scal = jnp.array([[p['w11'], p['w12']], [p['w21'], p['w22']]], dtype=jnp.float32)
    Wo = jnp.stack([p['Wo'], p['Wod']], 0)
    bo = jnp.stack([p['bo'], p['bod']], 0)
    W1 = jnp.stack([p['W1'], p['W1d']], 0)
    b1 = jnp.stack([p['b1'], p['b1d']], 0)
    g1 = jnp.stack([p['ln_ffn_g'], p['ln_ffnd_g']], 0)
    b1ln = jnp.stack([p['ln_ffn_b'], p['ln_ffnd_b']], 0)
    x1, h = blend_ffn1_2s(ctx, Wo, bo, s_attn, xy, scal, g1, b1ln, W1, b1)

    # fc2 + residual + final encoder LayerNorm (both streams, one call)
    W2 = jnp.stack([p['W2'], p['W2d']], 0)
    b2 = jnp.stack([p['b2'], p['b2d']], 0)
    ge = jnp.stack([p['ln_enc_g'], p['ln_encd_g']], 0)
    be = jnp.stack([p['ln_enc_b'], p['ln_encd_b']], 0)
    out = ffn2_ln_2s(h, W2, b2, x1, ge, be)                             # (2, rows, C)
    return out[0].reshape(B, L, C), out[1].reshape(B, L, C)


# ------------------------------------------------------------------------ pure-JAX reference

def encoder_ref(p, x, y, *, resolution, split, nh_lepe, nh_global):
    def ln(t, g, b):
        mu = jnp.mean(t, -1, keepdims=True)
        var = jnp.mean((t - mu) ** 2, -1, keepdims=True)
        return (t - mu) / jnp.sqrt(var + EPS) * g + b

    def lin(t, W, b):
        return t @ W.T + b

    B, L, C = x.shape
    hx, hy = x, y
    xn = ln(x, p['ln_attn_g'], p['ln_attn_b'])
    yn = ln(y, p['ln_attnd_g'], p['ln_attnd_b'])
    qx, kx, vx = lin(xn, p['Wq'], p['bq']), lin(xn, p['Wk'], p['bk']), lin(xn, p['Wv'], p['bv'])
    qy, ky, vy = lin(yn, p['Wqd'], p['bqd']), lin(yn, p['Wkd'], p['bkd']), lin(yn, p['Wvd'], p['bvd'])

    def lepe_ref(q, k, v, idx, conv_w=None, conv_b=None):
        H = W = resolution
        H_sp, W_sp = (resolution, split) if idx == 0 else (split, resolution)
        hd = C // nh_lepe
        qw = im2cswin(q, H, W, H_sp, W_sp, nh_lepe)
        kw = im2cswin(k, H, W, H_sp, W_sp, nh_lepe)
        vw = im2cswin(v, H, W, H_sp, W_sp, nh_lepe)
        attn = jax.nn.softmax((qw * hd ** -0.5) @ jnp.swapaxes(kw, -1, -2), axis=-1)
        out = attn @ vw
        if idx != 0:
            out = out + depthwise_lepe(v, conv_w, conv_b, H, W, H_sp, W_sp, nh_lepe)
        Bw = out.shape[0]
        out = out.transpose(0, 2, 1, 3).reshape(Bw, H_sp * W_sp, C)
        return windows2img(out, H_sp, W_sp, H, W).reshape(B, H * W, C)

    sx = lepe_ref(qx, ky, vy, 0)
    sy = lepe_ref(qy, kx, vx, 1, p['conv_w'], p['conv_b'])

    hd_g = C // nh_global

    def heads(t):
        return t.reshape(B, L, nh_global, hd_g).transpose(0, 2, 1, 3)

    def mha(q, k, v):
        a = jax.nn.softmax(heads(q) @ jnp.swapaxes(heads(k), -1, -2) * hd_g ** -0.5, axis=-1)
        return (a @ heads(v)).transpose(0, 2, 1, 3).reshape(B, L, C)

    cx = lin(mha(qx, ky, vy), p['Wo'], p['bo'])
    cy = lin(mha(qy, kx, vx), p['Wod'], p['bod'])

    x1 = p['w11'] * sx + p['w12'] * cx + hx
    y1 = p['w21'] * sy + p['w22'] * cy + hy

    def mlp(t, g, b_, W1, b1, W2, b2):
        h = jax.nn.gelu(lin(ln(t, g, b_), W1, b1), approximate=False)
        return lin(h, W2, b2)

    x2 = mlp(x1, p['ln_ffn_g'], p['ln_ffn_b'], p['W1'], p['b1'], p['W2'], p['b2']) + x1
    y2 = mlp(y1, p['ln_ffnd_g'], p['ln_ffnd_b'], p['W1d'], p['b1d'], p['W2d'], p['b2d']) + y1
    return ln(x2, p['ln_enc_g'], p['ln_enc_b']), ln(y2, p['ln_encd_g'], p['ln_encd_b'])


# --------------------------------------------------------------------------------- main

if __name__ == "__main__":
    # Encoder at i_layer=3: resolution=8 -> L=64, split_size=8, LePE heads=16//2=8.
    # Small config: hidden_size=32, 4 global attention heads, B=2.
    B = 2
    resolution = 8
    split = 8
    L = resolution * resolution
    C = 32
    nh_lepe = 8
    nh_global = 4

    key = jax.random.PRNGKey(0)
    keys = iter(jax.random.split(key, 48))

    def nrm(k, shape, s=1.0):
        return (s * jax.random.normal(k, shape)).astype(jnp.float32)

    def linear_params(out_d, in_d):
        return nrm(next(keys), (out_d, in_d), in_d ** -0.5), nrm(next(keys), (out_d,), 0.02)

    def ln_params():
        return 1.0 + nrm(next(keys), (C,), 0.1), nrm(next(keys), (C,), 0.05)

    p = {}
    p['ln_attn_g'], p['ln_attn_b'] = ln_params()
    p['ln_attnd_g'], p['ln_attnd_b'] = ln_params()
    p['Wq'], p['bq'] = linear_params(C, C)
    p['Wk'], p['bk'] = linear_params(C, C)
    p['Wv'], p['bv'] = linear_params(C, C)
    p['Wqd'], p['bqd'] = linear_params(C, C)
    p['Wkd'], p['bkd'] = linear_params(C, C)
    p['Wvd'], p['bvd'] = linear_params(C, C)
    p['Wo'], p['bo'] = linear_params(C, C)
    p['Wod'], p['bod'] = linear_params(C, C)
    p['conv_w'] = nrm(next(keys), (C, 1, 3, 3), 0.2)     # attns[1].get_v depthwise conv
    p['conv_b'] = nrm(next(keys), (C,), 0.02)
    p['w11'], p['w12'], p['w21'], p['w22'] = 0.7, 0.3, 0.6, 0.4
    p['ln_ffn_g'], p['ln_ffn_b'] = ln_params()
    p['ln_ffnd_g'], p['ln_ffnd_b'] = ln_params()
    p['W1'], p['b1'] = linear_params(4 * C, C)
    p['W2'], p['b2'] = linear_params(C, 4 * C)
    p['W1d'], p['b1d'] = linear_params(4 * C, C)
    p['W2d'], p['b2d'] = linear_params(C, 4 * C)
    p['ln_enc_g'], p['ln_enc_b'] = ln_params()
    p['ln_encd_g'], p['ln_encd_b'] = ln_params()

    x = nrm(next(keys), (B, L, C))
    y = nrm(next(keys), (B, L, C))

    ex, ey = encoder_pallas(p, x, y, resolution=resolution, split=split,
                            nh_lepe=nh_lepe, nh_global=nh_global)
    ex, ey = jax.block_until_ready((ex, ey))

    rx, ry = encoder_ref(p, x, y, resolution=resolution, split=split,
                         nh_lepe=nh_lepe, nh_global=nh_global)

    assert ex.shape == (B, L, C) and ey.shape == (B, L, C)
    assert jnp.allclose(ex, rx, atol=2e-3, rtol=2e-3), float(jnp.max(jnp.abs(ex - rx)))
    assert jnp.allclose(ey, ry, atol=2e-3, rtol=2e-3), float(jnp.max(jnp.abs(ey - ry)))

    print("KERNEL_OK")
</pallas_src>

<mosaic_0001>
module attributes {stable_mosaic.version = 11 : i64} {
  func.func @_ln_linear_kernel(%arg0: i32, %arg1: i32, %arg2: memref<1x128x32xf32, #tpu.memory_space<vmem>>, %arg3: memref<1x32x128xf32, #tpu.memory_space<vmem>>, %arg4: memref<1x1x128xf32, #tpu.memory_space<vmem>>, %arg5: memref<1x128x128xf32, #tpu.memory_space<vmem>>) attributes {dimension_semantics = [#tpu.dimension_semantics<parallel>, #tpu.dimension_semantics<parallel>], iteration_bounds = array<i64: 2, 1>, scalar_prefetch = 0 : i64, scratch_operands = 0 : i64, tpu.core_type = #tpu.core_type<tc>, window_params = [{transform_indices = @transform_0, window_bounds = array<i64: 1, 128, 32>}, {transform_indices = @transform_1, window_bounds = array<i64: 1, 32, 128>}, {transform_indices = @transform_2, window_bounds = array<i64: 1, 1, 128>}, {transform_indices = @transform_3, window_bounds = array<i64: 1, 128, 128>}]} {
    %c0 = arith.constant 0 : index
    %c0_0 = arith.constant 0 : index
    %c0_1 = arith.constant 0 : index
    %0 = vector.load %arg2[%c0, %c0_0, %c0_1] : memref<1x128x32xf32, #tpu.memory_space<vmem>>, vector<1x128x32xf32>
    %1 = vector.shape_cast %0 : vector<1x128x32xf32> to vector<128x32xf32>
    %cst = arith.constant dense<0.000000e+00> : vector<128xf32>
    %2 = vector.multi_reduction <add>, %1, %cst [1] : vector<128x32xf32> to vector<128xf32>
    %3 = vector.shape_cast %2 : vector<128xf32> to vector<128x1xf32>
    %cst_2 = arith.constant 3.200000e+01 : f32
    %4 = vector.broadcast %cst_2 : f32 to vector<128x1xf32>
    %5 = arith.divf %3, %4 : vector<128x1xf32>
    %6 = vector.broadcast %5 : vector<128x1xf32> to vector<128x32xf32>
    %7 = arith.subf %1, %6 : vector<128x32xf32>
    %8 = arith.mulf %7, %7 : vector<128x32xf32>
    %cst_3 = arith.constant dense<0.000000e+00> : vector<128xf32>
    %9 = vector.multi_reduction <add>, %8, %cst_3 [1] : vector<128x32xf32> to vector<128xf32>
    %10 = vector.shape_cast %9 : vector<128xf32> to vector<128x1xf32>
    %cst_4 = arith.constant 3.200000e+01 : f32
    %11 = vector.broadcast %cst_4 : f32 to vector<128x1xf32>
    %12 = arith.divf %10, %11 : vector<128x1xf32>
    %cst_5 = arith.constant 9.99999997E-7 : f32
    %13 = vector.broadcast %cst_5 : f32 to vector<128x1xf32>
    %14 = arith.addf %12, %13 : vector<128x1xf32>
    %15 = math.rsqrt %14 : vector<128x1xf32>
    %16 = vector.broadcast %15 : vector<128x1xf32> to vector<128x32xf32>
    %17 = arith.mulf %7, %16 : vector<128x32xf32>
    %c0_6 = arith.constant 0 : index
    %c0_7 = arith.constant 0 : index
    %c0_8 = arith.constant 0 : index
    %18 = vector.load %arg3[%c0_6, %c0_7, %c0_8] : memref<1x32x128xf32, #tpu.memory_space<vmem>>, vector<1x32x128xf32>
    %19 = vector.shape_cast %18 : vector<1x32x128xf32> to vector<32x128xf32>
    %cst_9 = arith.constant dense<0.000000e+00> : vector<128x128xf32>
    %20 = tpu.matmul %17, %19, %cst_9 {dimension_numbers = #tpu.dot_dimension_numbers<[1], [0], [0], [1], [0, 0, 1, 1], [], []>} : vector<128x32xf32>, vector<32x128xf32>, vector<128x128xf32> -> vector<128x128xf32>
    %c0_10 = arith.constant 0 : index
    %c0_11 = arith.constant 0 : index
    %c0_12 = arith.constant 0 : index
    %21 = vector.load %arg4[%c0_10, %c0_11, %c0_12] : memref<1x1x128xf32, #tpu.memory_space<vmem>>, vector<1x1x128xf32>
    %22 = vector.shape_cast %21 : vector<1x1x128xf32> to vector<1x128xf32>
    %23 = vector.broadcast %22 : vector<1x128xf32> to vector<128x128xf32>
    %24 = arith.addf %20, %23 : vector<128x128xf32>
    %c0_13 = arith.constant 0 : index
    %c0_14 = arith.constant 0 : index
    %c0_15 = arith.constant 0 : index
    %25 = vector.load %arg5[%c0_13, %c0_14, %c0_15] : memref<1x128x128xf32, #tpu.memory_space<vmem>>, vector<1x128x128xf32>
    %26 = vector.shape_cast %25 : vector<1x128x128xf32> to vector<128x128xf32>
    %27 = vector.shape_cast %24 : vector<128x128xf32> to vector<1x128x128xf32>
    tpu.vector_store %arg5[%c0_13, %c0_14, %c0_15], %27 {strides = array<i32>} : memref<1x128x128xf32, #tpu.memory_space<vmem>>, vector<1x128x128xf32>,
    return
  }
  func.func @transform_0(%arg0: i32, %arg1: i32) -> (i32, i32, i32) {
    %c0_i32 = arith.constant 0 : i32
    %c0_i32_0 = arith.constant 0 : i32
    return %arg0, %arg1, %c0_i32 : i32, i32, i32
  }
  func.func @transform_1(%arg0: i32, %arg1: i32) -> (i32, i32, i32) {
    %c0_i32 = arith.constant 0 : i32
    %c0_i32_0 = arith.constant 0 : i32
    %c0_i32_1 = arith.constant 0 : i32
    return %arg0, %c0_i32, %c0_i32_0 : i32, i32, i32
  }
  func.func @transform_2(%arg0: i32, %arg1: i32) -> (i32, i32, i32) {
    %c0_i32 = arith.constant 0 : i32
    %c0_i32_0 = arith.constant 0 : i32
    %c0_i32_1 = arith.constant 0 : i32
    return %arg0, %c0_i32, %c0_i32_0 : i32, i32, i32
  }
  func.func @transform_3(%arg0: i32, %arg1: i32) -> (i32, i32, i32) {
    %c0_i32 = arith.constant 0 : i32
    %c0_i32_0 = arith.constant 0 : i32
    return %arg0, %arg1, %c0_i32 : i32, i32, i32
  }
}

</mosaic_0001>

<bundles_post_ra>
// kernel: tpu_custom_call.1
= control target key start
LH: loop header
LB: loop body
LE: loop exit
PB: predicated region body
PF: predicated region fallthrough
CT: control target
= control target key end

     0   :  { %8 = vsyncpa [#allocation3], 0  ;;  %s1415_s0 = inlined_call_operand.vmem [shape: f32[2,128,32], index: 0, kind: input, shape index: {}]   ;;  %s1416_s1 = inlined_call_operand.vmem [shape: f32[2,32,128], index: 1, kind: input, shape index: {}]   ;;  %s1417_s2 = inlined_call_operand.vmem [shape: f32[2,1,128], index: 2, kind: input, shape index: {}]   ;;  %s1418_s3 = inlined_call_operand.hbm [shape: f32[2,128,128], index: 3, kind: output, shape index: {}]  }
   0x1   :  { %10 = vsyncpa [#allocation3 + $0x1], 0  ;;  %s1081_s12 = smov 0   ;;  %s1083_s13 = smov 0  }
   0x2   :  { %s1085_s14 = smov 0   ;;  %s1087_s15 = smov 0  }
   0x3   :  { %s1089_s16 = smov 0   ;;  %s1091_s17 = smov 0  }
   0x4 LB: > { %s796_s18 = sadd.s32 4294967295, %s1056_s17   ;;  %s797_s19 = sadd.s32 4294967294, %s1056_s17   ;;  %s1056_s17 = sphi %s1091_s17, %s16_s17   ;;  %s1052_s16 = sphi %s1089_s16, %s1425_s16   ;;  %s1048_s15 = sphi %s1087_s15, %s1424_s15   ;;  %s1044_s14 = sphi %s1085_s14, %s1423_s14   ;;  %s1040_s13 = sphi %s1083_s13, %s1422_s13   ;;  %s1036_s12 = sphi %s1081_s12, %s1421_s12  }
   0x5   : > { %s28_s20 = sadd.s32 1, %s1052_s16  ;;  %s117_s21 = sadd.s32 1, %s1044_s14 }
   0x6   : > { %p30_p0 = scmp.ge.s32.totalorder %s28_s20, 2  ;;  %p127_p1 = scmp.ne.s32.totalorder %s1044_s14, %s1040_s13 }
   0x7   : > { %p128_p2 = scmp.eq.s32.totalorder %s796_s18, 1  ;;  %p133_p3 = scmp.ne.s32.totalorder %s1040_s13, %s1036_s12 }
   0x8   : > { %s1427_s20 = smov (%p30_p0, %s28_s20), 0  ;;  %p134_p5 = scmp.eq.s32.totalorder %s797_s19, 1 }
   0x9   : > { %p1121_p4 = por %p128_p2, %p127_p1  ;;  %s112_s23 = ssub.s32 %s1052_s16, %s1427_s20 }
   0xa   : > { %p800_p6 = scmp.ge.s32.totalorder %s1056_s17, 1  ;;  %p115_p7 = scmp.eq.s32.totalorder %s112_s23, 0 }
   0xb   : > { %p1128_p8 = por %p134_p5, %p133_p3  ;;  %p179_p9 = scmp.lt.s32.totalorder %s1056_s17, 3 }
   0xc   : > { %s1134_s25 = scalar_select %p115_p7, %s1044_s14, %s117_s21  }
   0xd   : > { %p180_p10 = pnand %p800_p6, %p179_p9 }
   0xe   : > { %p216_p11 = scmp.lt.s32.totalorder (!%p180_p10), %s1048_s15, 1  ;;  %s212_s8 = sand.u32 (!%p180_p10), 1, %s1040_s13  }
   0xf   : > { %183 = sbr.rel (%p180_p10) target bundleno = 572 (0x23c), region = 32  ;;  %s801_s18 = sshll.u32 (!%p180_p10), %s212_s8, 7 }
  0x10   : > { %s1341_s19 = scalar_lea.vmem (!%p180_p10), [#allocation2], %s801_s18  ;;  %s830_s21 = sshll.u32 (!%p180_p10), %s1048_s15, 11 }
  0x11   : > { %s696_s23 = sshll.u32 (!%p180_p10), %s1341_s19, 4  ;;  %s1362_s28 = scalar_lea.hbm (!%p180_p10), %s1418_s3, %s830_s21  ;;  %s1364_s23 = int_to_ptr.vmem [resolvable:$true] %s696_s23 }
  0x12   : > { %s980_s29 = scalar_lea.vmem (!%p180_p10), %s1364_s23, 2048 }
  0x13   : > { %p981_p12 = scmp.ne.s32.totalorder (!%p180_p10), %s1364_s23, %s980_s29 }
  0x14   : > { %s1138_s26 = scalar_select %p216_p11, %s1048_s15, 1  ;;  %vm250_vm0 = vcmask 261120  }
  0x15   : > { %s1370_s15 = scalar_lea.sflag [#allocation3], %s212_s8  ;;  %p982_p13 = pnand %p981_p12, %p1121_p4 }
  0x16   : > { %s828_s27 = sshll.u32 %s1138_s26, 7  ;;  %s829_s4 = sshll.u32 %s1138_s26, 5 }
  0x17   : > { %s1144_s30 = scalar_lea.vmem %s1415_s0, %s828_s27  ;;  %s229_s7 = scalar_lea.vmem %s1416_s1, %s829_s4 }
  0x18   : > { %v234_v0 = vld [vmem:[%s1144_s30] sm:$0xff]  ;;  %v235_v1 = vld [vmem:[%s1144_s30 + $0x8] sm:$0xff]  ;;  %v236_v8 = vld [vmem:[%s1144_s30 + $0x10] sm:$0xff]  ;;  %s232_s11 = scalar_lea.vmem %s1417_s2, %s1138_s26  ;;  %p983_p0 = pneg %p982_p13 }
  0x19   : > { %v242_v2 = vld [vmem:[%s1144_s30 + $0x40] sm:$0xff]  ;;  %v251_v3 = vsel %vm250_vm0, %v234_v0, 0.0  ;;  %v254_v4 = vsel %vm250_vm0, %v235_v1, 0.0  ;;  %v243_v5 = vld [vmem:[%s1144_s30 + $0x48] sm:$0xff]  ;;  %v244_v9 = vld [vmem:[%s1144_s30 + $0x50] sm:$0xff]  ;;  %v257_v10 = vsel %vm250_vm0, %v236_v8, 0.0 }
  0x1a   : > { %252 = vadd.xlane.f32.xlu0 %v251_v3  ;;  %255 = vadd.xlane.f32.xlu1 %v254_v4  ;;  %v275_v6 = vsel %vm250_vm0, %v242_v2, 0.0  ;;  %v278_v7 = vsel %vm250_vm0, %v243_v5, 0.0  ;;  %v281_v11 = vsel %vm250_vm0, %v244_v9, 0.0  ;;  %v1159_v12 = vld [vmem:[%s1144_s30 + $0x18] sm:$0xff]  ;;  %v1169_v16 = vld [vmem:[%s1144_s30 + $0x20] sm:$0xff]  ;;  %v1179_v20 = vld [vmem:[%s1144_s30 + $0x28] sm:$0xff] }
  0x1b   : > { %v1162_v13 = vld [vmem:[%s1144_s30 + $0x58] sm:$0xff]  ;;  %v260_v14 = vsel %vm250_vm0, %v1159_v12, 0.0  ;;  %v1172_v17 = vld [vmem:[%s1144_s30 + $0x60] sm:$0xff]  ;;  %v263_v18 = vsel %vm250_vm0, %v1169_v16, 0.0  ;;  %v1182_v21 = vld [vmem:[%s1144_s30 + $0x68] sm:$0xff]  ;;  %v266_v22 = vsel %vm250_vm0, %v1179_v20, 0.0 }
  0x1c   : > { %v284_v15 = vsel %vm250_vm0, %v1162_v13, 0.0  ;;  %v287_v19 = vsel %vm250_vm0, %v1172_v17, 0.0  ;;  %v290_v23 = vsel %vm250_vm0, %v1182_v21, 0.0  ;;  %v1189_v24 = vld [vmem:[%s1144_s30 + $0x30] sm:$0xff]  ;;  %v1199_v28 = vld [vmem:[%s1144_s30 + $0x38] sm:$0xff] }
  0x1d   : > { %v1192_v25 = vld [vmem:[%s1144_s30 + $0x70] sm:$0xff]  ;;  %v269_v26 = vsel %vm250_vm0, %v1189_v24, 0.0  ;;  %v1202_v29 = vld [vmem:[%s1144_s30 + $0x78] sm:$0xff]  ;;  %v272_v30 = vsel %vm250_vm0, %v1199_v28, 0.0  ;;  %s1058_s30 = smov [#allocation2]  }
  0x1e   : > { %276 = vadd.xlane.f32.xlu0 %v275_v6  ;;  %279 = vadd.xlane.f32.xlu1 %v278_v7  ;;  %v293_v27 = vsel %vm250_vm0, %v1192_v25, 0.0  ;;  %v296_v31 = vsel %vm250_vm0, %v1202_v29, 0.0  ;;  %s984_s4 = sshll.u32 %s1058_s30, 4  ;;  %s985_s4 = int_to_ptr.vmem [resolvable:$false] %s984_s4 }
  0x1f   : > { %s986_s5 = scalar_lea.vmem %s985_s4, 4096  ;;  %p987_p1 = scmp.lt.s32.totalorder %s1364_s23, %s985_s4 }
  0x20   : > { %p988_p2 = scmp.lt.s32.totalorder %s986_s5, %s980_s29 }
  0x22   : > { %258 = vadd.xlane.f32.xlu0 %v257_v10  ;;  %282 = vadd.xlane.f32.xlu1 %v281_v11  ;;  %p989_p3 = por %p988_p2, %p987_p1 }
  0x24   : > { %p990_p5 = pnand %p989_p3, %p983_p0 }
  0x26   : > { %261 = vadd.xlane.f32.xlu0 %v260_v14  ;;  %285 = vadd.xlane.f32.xlu1 %v284_v15 }
  0x2a   : > { %264 = vadd.xlane.f32.xlu0 %v263_v18  ;;  %288 = vadd.xlane.f32.xlu1 %v287_v19 }
  0x2e   : > { %267 = vadd.xlane.f32.xlu0 %v266_v22  ;;  %291 = vadd.xlane.f32.xlu1 %v290_v23 }
  0x32   : > { %270 = vadd.xlane.f32.xlu0 %v269_v26  ;;  %294 = vadd.xlane.f32.xlu1 %v293_v27 }
  0x36   : > { %273 = vadd.xlane.f32.xlu0 %v272_v30  ;;  %297 = vadd.xlane.f32.xlu1 %v296_v31 }
  0xa3   : > { %v253_v32 = vpop.xlane.xlu0 %252  ;;  %v256_v33 = vpop.xlane.xlu1 %255 }
  0xa4   : > { %v300_v34 = vmul.f32 0.03125, %v253_v32  ;;  %v301_v35 = vmul.f32 0.03125, %v256_v33 }
  0xa6   : > { %v1208_v36 = vsub.f32 %v234_v0, %v300_v34  ;;  %v1210_v37 = vsub.f32 %v235_v1, %v301_v35 }
  0xa7   : > { %v277_v38 = vpop.xlane.xlu0 %276  ;;  %v280_v39 = vpop.xlane.xlu1 %279 }
  0xa8   : > { %v308_v40 = vmul.f32 0.03125, %v277_v38  ;;  %v309_v41 = vmul.f32 0.03125, %v280_v39  ;;  %v332_v42 = vmul.f32 %v1208_v36, %v1208_v36  ;;  %v333_v43 = vmul.f32 %v1210_v37, %v1210_v37 }
  0xaa   : > { %v1216_v44 = vsub.f32 %v242_v2, %v308_v40  ;;  %v1218_v45 = vsub.f32 %v243_v5, %v309_v41  ;;  %v348_v46 = vsel %vm250_vm0, %v332_v42, 0.0  ;;  %v351_v49 = vsel %vm250_vm0, %v333_v43, 0.0 }
  0xab   : > { %349 = vadd.xlane.f32.xlu0 %v348_v46  ;;  %v259_v47 = vpop.xlane.xlu0 %258  ;;  %v283_v48 = vpop.xlane.xlu1 %282 }
  0xac   : > { %v302_v50 = vmul.f32 0.03125, %v259_v47  ;;  %v310_v51 = vmul.f32 0.03125, %v283_v48  ;;  %v340_v52 = vmul.f32 %v1216_v44, %v1216_v44  ;;  %v341_v53 = vmul.f32 %v1218_v45, %v1218_v45 }
  0xae   : > { %v1226_v54 = vsub.f32 %v236_v8, %v302_v50  ;;  %v1228_v55 = vsub.f32 %v244_v9, %v310_v51  ;;  %v372_v56 = vsel %vm250_vm0, %v340_v52, 0.0  ;;  %v375_v59 = vsel %vm250_vm0, %v341_v53, 0.0  ;;  %v462_v52 = vld [vmem:[%s229_s7 + $0x10] sm:$0xff] }
  0xaf   : > { %352 = vadd.xlane.f32.xlu0 %v351_v49  ;;  %373 = vadd.xlane.f32.xlu1 %v372_v56  ;;  %v262_v57 = vpop.xlane.xlu0 %261  ;;  %v286_v58 = vpop.xlane.xlu1 %285  ;;  %v461_v56 = vld [vmem:[%s229_s7 + $0x8] sm:$0xff] }
  0xb0   : > { %v303_v60 = vmul.f32 0.03125, %v262_v57  ;;  %v311_v61 = vmul.f32 0.03125, %v286_v58  ;;  %v334_v62 = vmul.f32 %v1226_v54, %v1226_v54  ;;  %v342_v63 = vmul.f32 %v1228_v55, %v1228_v55  ;;  %v460_v57 = vld [vmem:[%s229_s7] sm:$0xff] }
  0xb2   : > { %v1237_v0 = vsub.f32 %v1159_v12, %v303_v60  ;;  %v1240_v1 = vsub.f32 %v1162_v13, %v311_v61  ;;  %v354_v2 = vsel %vm250_vm0, %v334_v62, 0.0  ;;  %v378_v5 = vsel %vm250_vm0, %v342_v63, 0.0 }
  0xb3   : > { %376 = vadd.xlane.f32.xlu1 %v375_v59  ;;  %355 = vadd.xlane.f32.xlu0 %v354_v2  ;;  %v265_v3 = vpop.xlane.xlu0 %264  ;;  %v289_v4 = vpop.xlane.xlu1 %288 }
  0xb4   : > { %v304_v6 = vmul.f32 0.03125, %v265_v3  ;;  %v312_v7 = vmul.f32 0.03125, %v289_v4  ;;  %v335_v8 = vmul.f32 %v1237_v0, %v1237_v0  ;;  %v343_v9 = vmul.f32 %v1240_v1, %v1240_v1 }
  0xb6   : > { %v1249_v10 = vsub.f32 %v1169_v16, %v304_v6  ;;  %v1252_v11 = vsub.f32 %v1172_v17, %v312_v7  ;;  %v357_v12 = vsel %vm250_vm0, %v335_v8, 0.0  ;;  %v381_v15 = vsel %vm250_vm0, %v343_v9, 0.0 }
  0xb7   : > { %379 = vadd.xlane.f32.xlu1 %v378_v5  ;;  %358 = vadd.xlane.f32.xlu0 %v357_v12  ;;  %v268_v13 = vpop.xlane.xlu0 %267  ;;  %v292_v14 = vpop.xlane.xlu1 %291 }
  0xb8   : > { %v305_v18 = vmul.f32 0.03125, %v268_v13  ;;  %v313_v19 = vmul.f32 0.03125, %v292_v14  ;;  %v336_v22 = vmul.f32 %v1249_v10, %v1249_v10  ;;  %v344_v16 = vmul.f32 %v1252_v11, %v1252_v11 }
  0xba   : > { %v1261_v23 = vsub.f32 %v1179_v20, %v305_v18  ;;  %v1264_v17 = vsub.f32 %v1182_v21, %v313_v19  ;;  %v360_v26 = vsel %vm250_vm0, %v336_v22, 0.0  ;;  %v384_v31 = vsel %vm250_vm0, %v344_v16, 0.0 }
  0xbb   : > { %382 = vadd.xlane.f32.xlu1 %v381_v15  ;;  %361 = vadd.xlane.f32.xlu0 %v360_v26  ;;  %v271_v27 = vpop.xlane.xlu0 %270  ;;  %v295_v30 = vpop.xlane.xlu1 %294 }
  0xbc   : > { %v306_v32 = vmul.f32 0.03125, %v271_v27  ;;  %v314_v33 = vmul.f32 0.03125, %v295_v30  ;;  %v337_v34 = vmul.f32 %v1261_v23, %v1261_v23  ;;  %v345_v20 = vmul.f32 %v1264_v17, %v1264_v17 }
  0xbe   : > { %v1273_v35 = vsub.f32 %v1189_v24, %v306_v32  ;;  %v1276_v21 = vsub.f32 %v1192_v25, %v314_v33  ;;  %v363_v38 = vsel %vm250_vm0, %v337_v34, 0.0  ;;  %v387_v41 = vsel %vm250_vm0, %v345_v20, 0.0 }
  0xbf   : > { %385 = vadd.xlane.f32.xlu1 %v384_v31  ;;  %364 = vadd.xlane.f32.xlu0 %v363_v38  ;;  %v274_v39 = vpop.xlane.xlu0 %273  ;;  %v298_v40 = vpop.xlane.xlu1 %297 }
  0xc0   : > { %v307_v42 = vmul.f32 0.03125, %v274_v39  ;;  %v315_v43 = vmul.f32 0.03125, %v298_v40  ;;  %v338_v46 = vmul.f32 %v1273_v35, %v1273_v35  ;;  %v346_v24 = vmul.f32 %v1276_v21, %v1276_v21 }
  0xc2   : > { %v1285_v25 = vsub.f32 %v1199_v28, %v307_v42  ;;  %v1288_v47 = vsub.f32 %v1202_v29, %v315_v43  ;;  %v366_v48 = vsel %vm250_vm0, %v338_v46, 0.0  ;;  %v390_v49 = vsel %vm250_vm0, %v346_v24, 0.0  ;;  %v463_v28 = vld [vmem:[%s229_s7 + $0x18] sm:$0xff] }
  0xc3   : > { %388 = vadd.xlane.f32.xlu1 %v387_v41  ;;  %367 = vadd.xlane.f32.xlu0 %v366_v48 }
  0xc4   : > { %v339_v50 = vmul.f32 %v1285_v25, %v1285_v25  ;;  %v347_v51 = vmul.f32 %v1288_v47, %v1288_v47  ;;  %851 = vmatprep.subr.mxu0 %v463_v28  ;;  %883 = vmatprep.subr.mxu1 %v463_v28 }
  0xc5   : > { %852 = vmatpush3.msra.mxu0 %v463_v28  ;;  %887 = vmatpush3.msra.mxu1 %v463_v28 }
  0xc6   : > { %v369_v29 = vsel %vm250_vm0, %v339_v50, 0.0  ;;  %v393_v53 = vsel %vm250_vm0, %v347_v51, 0.0  ;;  %853 = vmatprep.subr.mxu0 %v462_v52  ;;  %884 = vmatprep.subr.mxu1 %v462_v52 }
  0xc7   : > { %391 = vadd.xlane.f32.xlu1 %v390_v49  ;;  %370 = vadd.xlane.f32.xlu0 %v369_v29 }
  0xc8   : > { %854 = vmatpush3.msra.mxu0 %v462_v52  ;;  %888 = vmatpush3.msra.mxu1 %v462_v52 }
  0xc9   : > { %855 = vmatprep.subr.mxu0 %v461_v56  ;;  %885 = vmatprep.subr.mxu1 %v461_v56 }
  0xca   : > { %856 = vmatpush3.msra.mxu0 %v461_v56  ;;  %889 = vmatpush3.msra.mxu1 %v461_v56 }
  0xcb   : > { %394 = vadd.xlane.f32.xlu1 %v393_v53  ;;  %857 = vmatprep.subr.mxu0 %v460_v57 }
  0xcc   : > { %858 = vmatpush3.msra.mxu0 %v460_v57  ;;  %886 = vmatprep.subr.mxu1 %v460_v57 }
  0xcd   : > { %890 = vmatpush3.msra.mxu1 %v460_v57 }
 0x134   : > { %v350_v58 = vpop.xlane.xlu0 %349 }
 0x135   : > { %v396_v59 = vmul.f32 0.03125, %v350_v58 }
 0x137   : > { %v412_v60 = vadd.f32 1e-06, %v396_v59 }
 0x138   : > { %v374_v61 = vpop.xlane.xlu1 %373  ;;  %v353_v62 = vpop.xlane.xlu0 %352 }
 0x139   : > { %948 = vrsqrt.f32 %v412_v60  ;;  %v404_v63 = vmul.f32 0.03125, %v374_v61  ;;  %v397_v2 = vmul.f32 0.03125, %v353_v62 }
 0x13b   : > { %v420_v3 = vadd.f32 1e-06, %v404_v63  ;;  %v413_v4 = vadd.f32 1e-06, %v397_v2 }
 0x13c   : > { %v377_v5 = vpop.xlane.xlu1 %376  ;;  %v356_v6 = vpop.xlane.xlu0 %355 }
 0x13d   : > { %950 = vrsqrt.f32 %v420_v3  ;;  %v405_v7 = vmul.f32 0.03125, %v377_v5  ;;  %v398_v8 = vmul.f32 0.03125, %v356_v6 }
 0x13e   : > { %952 = vrsqrt.f32 %v413_v4 }
 0x13f   : > { %v421_v9 = vadd.f32 1e-06, %v405_v7  ;;  %v414_v12 = vadd.f32 1e-06, %v398_v8 }
 0x140   : > { %v380_v13 = vpop.xlane.xlu1 %379  ;;  %v359_v14 = vpop.xlane.xlu0 %358 }
 0x141   : > { %954 = vrsqrt.f32 %v421_v9  ;;  %v406_v15 = vmul.f32 0.03125, %v380_v13  ;;  %v399_v18 = vmul.f32 0.03125, %v359_v14 }
 0x142   : > { %956 = vrsqrt.f32 %v414_v12 }
 0x143   : > { %v422_v19 = vadd.f32 1e-06, %v406_v15  ;;  %v415_v22 = vadd.f32 1e-06, %v399_v18 }
 0x144   : > { %v383_v16 = vpop.xlane.xlu1 %382  ;;  %v362_v26 = vpop.xlane.xlu0 %361 }
 0x145   : > { %958 = vrsqrt.f32 %v422_v19  ;;  %v407_v27 = vmul.f32 0.03125, %v383_v16  ;;  %v400_v30 = vmul.f32 0.03125, %v362_v26 }
 0x146   : > { %v949_v31 = vpop.eup %948  ;;  %960 = vrsqrt.f32 %v415_v22 }
 0x147   : > { %v423_v32 = vadd.f32 1e-06, %v407_v27  ;;  %v416_v33 = vadd.f32 1e-06, %v400_v30  ;;  %v444_v34 = vmul.f32 %v949_v31, %v1208_v36 }
 0x148   : > { %v386_v20 = vpop.xlane.xlu1 %385  ;;  %v365_v38 = vpop.xlane.xlu0 %364 }
 0x149   : > { %962 = vrsqrt.f32 %v423_v32  ;;  %v408_v39 = vmul.f32 0.03125, %v386_v20  ;;  %v401_v40 = vmul.f32 0.03125, %v365_v38  ;;  %859 = vmatprep.mubr.msk.f32.mxu0 %vm250_vm0, %v444_v34 }
 0x14a   : > { %v951_v41 = vpop.eup %950  ;;  %964 = vrsqrt.f32 %v416_v33 }
 0x14b   : > { %v953_v42 = vpop.eup %952  ;;  %v424_v43 = vadd.f32 1e-06, %v408_v39  ;;  %v417_v46 = vadd.f32 1e-06, %v401_v40  ;;  %v452_v24 = vmul.f32 %v951_v41, %v1216_v44 }
 0x14c   : > { %v389_v48 = vpop.xlane.xlu1 %388  ;;  %v368_v49 = vpop.xlane.xlu0 %367  ;;  %v445_v50 = vmul.f32 %v953_v42, %v1210_v37 }
 0x14d   : > { %966 = vrsqrt.f32 %v424_v43  ;;  %v409_v36 = vmul.f32 0.03125, %v389_v48  ;;  %v402_v51 = vmul.f32 0.03125, %v368_v49  ;;  %871 = vmatprep.mubr.msk.f32.mxu1 %vm250_vm0, %v452_v24 }
 0x14e   : > { %v955_v28 = vpop.eup %954  ;;  %968 = vrsqrt.f32 %v417_v46  ;;  %860 = vmatmul.mubr.msk.f32.vlgmr.msra.gmra.mxu0 %vm250_vm0, %v445_v50 }
 0x14f   : > { %v957_v29 = vpop.eup %956  ;;  %v425_v52 = vadd.f32 1e-06, %v409_v36  ;;  %v418_v53 = vadd.f32 1e-06, %v402_v51  ;;  %v453_v56 = vmul.f32 %v955_v28, %v1218_v45 }
 0x150   : > { %v392_v57 = vpop.xlane.xlu1 %391  ;;  %v371_v44 = vpop.xlane.xlu0 %370  ;;  %v446_v58 = vmul.f32 %v957_v29, %v1226_v54 }
 0x151   : > { %970 = vrsqrt.f32 %v425_v52  ;;  %v410_v37 = vmul.f32 0.03125, %v392_v57  ;;  %v403_v59 = vmul.f32 0.03125, %v371_v44  ;;  %872 = vmatmul.mubr.msk.f32.vlgmr.msra.gmra.mxu1 %vm250_vm0, %v453_v56 }
 0x152   : > { %v959_v60 = vpop.eup %958  ;;  %972 = vrsqrt.f32 %v418_v53  ;;  %862 = vmatprep.mubr.msk.f32.mxu0 %vm250_vm0, %v446_v58 }
 0x153   : > { %v961_v61 = vpop.eup %960  ;;  %v426_v62 = vadd.f32 1e-06, %v410_v37  ;;  %v419_v63 = vadd.f32 1e-06, %v403_v59  ;;  %v454_v2 = vmul.f32 %v959_v60, %v1228_v55 }
 0x154   : > { %v395_v3 = vpop.xlane.xlu1 %394  ;;  %v447_v45 = vmul.f32 %v961_v61, %v1237_v0 }
 0x155   : > { %974 = vrsqrt.f32 %v426_v62  ;;  %v411_v4 = vmul.f32 0.03125, %v395_v3  ;;  %874 = vmatprep.mubr.msk.f32.mxu1 %vm250_vm0, %v454_v2 }
 0x156   : > { %v963_v54 = vpop.eup %962  ;;  %976 = vrsqrt.f32 %v419_v63  ;;  %863 = vmatmul.mubr.msk.f32.gmra.mxu0 %vm250_vm0, %v447_v45 }
 0x157   : > { %v965_v5 = vpop.eup %964  ;;  %v427_v6 = vadd.f32 1e-06, %v411_v4  ;;  %v455_v7 = vmul.f32 %v963_v54, %v1240_v1 }
 0x158   : > { %v448_v8 = vmul.f32 %v965_v5, %v1249_v10 }
 0x159   : > { %978 = vrsqrt.f32 %v427_v6  ;;  %875 = vmatmul.mubr.msk.f32.gmra.mxu1 %vm250_vm0, %v455_v7 }
 0x15a   : > { %v967_v55 = vpop.eup %966  ;;  %865 = vmatprep.mubr.msk.f32.mxu0 %vm250_vm0, %v448_v8 }
 0x15b   : > { %v969_v0 = vpop.eup %968  ;;  %v456_v9 = vmul.f32 %v967_v55, %v1252_v11 }
 0x15c   : > { %v449_v12 = vmul.f32 %v969_v0, %v1261_v23 }
 0x15d   : > { %877 = vmatprep.mubr.msk.f32.mxu1 %vm250_vm0, %v456_v9 }
 0x15e   : > { %v971_v13 = vpop.eup %970  ;;  %866 = vmatmul.mubr.msk.f32.gmra.mxu0 %vm250_vm0, %v449_v12 }
 0x15f   : > { %v973_v1 = vpop.eup %972  ;;  %v457_v10 = vmul.f32 %v971_v13, %v1264_v17  ;;  %v806_v17 = vld [vmem:[%s232_s11] ss:$0 sm:$0xff] }
 0x160   : > { %v450_v14 = vmul.f32 %v973_v1, %v1273_v35 }
 0x161   : > { %878 = vmatmul.mubr.msk.f32.gmra.mxu1 %vm250_vm0, %v457_v10 }
 0x162   : > { %v975_v15 = vpop.eup %974  ;;  %868 = vmatprep.mubr.msk.f32.mxu0 %vm250_vm0, %v450_v14 }
 0x163   : > { %v977_v11 = vpop.eup %976  ;;  %v458_v23 = vmul.f32 %v975_v15, %v1276_v21 }
 0x164   : > { %v451_v18 = vmul.f32 %v977_v11, %v1285_v25 }
 0x165   : > { %880 = vmatprep.mubr.msk.f32.mxu1 %vm250_vm0, %v458_v23 }
 0x166   : > { %v979_v19 = vpop.eup %978  ;;  %869 = vmatmul.mubr.msk.f32.gmra.mxu0 %vm250_vm0, %v451_v18 }
 0x167   : > { %v459_v22 = vmul.f32 %v979_v19, %v1288_v47 }
 0x169   : > { %881 = vmatmul.mubr.msk.f32.gmra.mxu1 %vm250_vm0, %v459_v22 }
 0x20e   : > { %v861_v35 = vpop.f32.mrf.mxu0 }
 0x20f   : > { %v591_v21 = vadd.f32 %v861_v35, %v806_v17 }
 0x210   : > { %v585_v25 = vpop.f32.mrf.mxu0 }
 0x211   : > { %665 = vst [vmem:[%s1341_s19 + $0x8] sm:$0xff] %v591_v21  ;;  %v586_v47 = vadd.f32 %v806_v17, %v585_v25  ;;  %v873_v16 = vpop.f32.mrf.mxu1 }
 0x212   : > { %v631_v26 = vadd.f32 %v873_v16, %v806_v17 }
 0x213   : > { %664 = vst [vmem:[%s1341_s19] sm:$0xff] %v586_v47  ;;  %v625_v27 = vpop.f32.mrf.mxu1 }
 0x214   : > { %673 = vst [vmem:[%s1341_s19 + $0x48] sm:$0xff] %v631_v26  ;;  %v626_v30 = vadd.f32 %v806_v17, %v625_v27 }
 0x216   : > { %672 = vst [vmem:[%s1341_s19 + $0x40] sm:$0xff] %v626_v30  ;;  %v864_v31 = vpop.f32.mrf.mxu0 }
 0x217   : > { %v601_v32 = vadd.f32 %v864_v31, %v806_v17 }
 0x218   : > { %v595_v33 = vpop.f32.mrf.mxu0 }
 0x219   : > { %667 = vst [vmem:[%s1341_s19 + $0x18] sm:$0xff] %v601_v32  ;;  %v596_v34 = vadd.f32 %v806_v17, %v595_v33  ;;  %v876_v20 = vpop.f32.mrf.mxu1 }
 0x21a   : > { %v641_v38 = vadd.f32 %v876_v20, %v806_v17 }
 0x21b   : > { %666 = vst [vmem:[%s1341_s19 + $0x10] sm:$0xff] %v596_v34  ;;  %v635_v39 = vpop.f32.mrf.mxu1 }
 0x21c   : > { %675 = vst [vmem:[%s1341_s19 + $0x58] sm:$0xff] %v641_v38  ;;  %v636_v40 = vadd.f32 %v806_v17, %v635_v39 }
 0x21e   : > { %674 = vst [vmem:[%s1341_s19 + $0x50] sm:$0xff] %v636_v40  ;;  %v867_v41 = vpop.f32.mrf.mxu0 }
 0x21f   : > { %v611_v42 = vadd.f32 %v867_v41, %v806_v17 }
 0x220   : > { %v605_v43 = vpop.f32.mrf.mxu0 }
 0x221   : > { %669 = vst [vmem:[%s1341_s19 + $0x28] sm:$0xff] %v611_v42  ;;  %v606_v46 = vadd.f32 %v806_v17, %v605_v43  ;;  %v879_v24 = vpop.f32.mrf.mxu1 }
 0x222   : > { %v651_v48 = vadd.f32 %v879_v24, %v806_v17 }
 0x223   : > { %668 = vst [vmem:[%s1341_s19 + $0x20] sm:$0xff] %v606_v46  ;;  %v645_v49 = vpop.f32.mrf.mxu1 }
 0x224   : > { %677 = vst [vmem:[%s1341_s19 + $0x68] sm:$0xff] %v651_v48  ;;  %v646_v50 = vadd.f32 %v806_v17, %v645_v49 }
 0x226   : > { %676 = vst [vmem:[%s1341_s19 + $0x60] sm:$0xff] %v646_v50  ;;  %v870_v36 = vpop.f32.mrf.mxu0 }
 0x227   : > { %v621_v51 = vadd.f32 %v870_v36, %v806_v17 }
 0x228   : > { %v615_v28 = vpop.f32.mrf.mxu0 }
 0x229   : > { %671 = vst [vmem:[%s1341_s19 + $0x38] sm:$0xff] %v621_v51  ;;  %v616_v29 = vadd.f32 %v806_v17, %v615_v28  ;;  %v882_v52 = vpop.f32.mrf.mxu1 }
 0x22a   : > { %v661_v53 = vadd.f32 %v882_v52, %v806_v17 }
 0x22b   : > { %670 = vst [vmem:[%s1341_s19 + $0x30] sm:$0xff] %v616_v29  ;;  %v655_v56 = vpop.f32.mrf.mxu1 }
 0x22c   : > { %679 = vst [vmem:[%s1341_s19 + $0x78] sm:$0xff] %v661_v53  ;;  %v656_v57 = vadd.f32 %v806_v17, %v655_v56 }
 0x22e   : > { %678 = vst [vmem:[%s1341_s19 + $0x70] sm:$0xff] %v656_v57 }
 0x22f   : > { %993 = shalt.err (!%p990_p5)
}
 0x230   : > { %s994_s6 = scalar_lea.hbm %s1362_s28, 2048  ;;  %s998_s9 = scalar_lea.hbm %s1418_s3, 4096 }
 0x231   : > { %p995_p6 = scmp.ne.s32.totalorder %s1362_s28, %s994_s6  ;;  %p999_p10 = scmp.lt.s32.totalorder %s1362_s28, %s1418_s3 }
 0x232   : > { %p1000_p11 = scmp.lt.s32.totalorder %s998_s9, %s994_s6 }
 0x233   : > { %p996_p7 = pnand %p995_p6, %p1121_p4 }
 0x234   : > { %p1001_p12 = por %p1000_p11, %p999_p10 }
 0x235   : > { %p997_p9 = pneg %p996_p7 }
 0x237   : > { %p1002_p13 = pnand %p1001_p12, %p997_p9 }
 0x239   : > { %1005 = shalt.err (!%p1002_p13)
}
 0x23a   : > { %s1059_s18 = smov 128   ;;  %s1060_s19 = smov 8  }
 0x23b   : > { %891 = dma.vmem_to_hbm [thread:$0]  (%p1121_p4), %s1364_s23, 2048, %s1362_s28, %s1370_s15, %s1059_s18, %s1059_s18, %s1060_s19  }
 0x23c PF: > { %p897_p0 = scmp.ge.s32.totalorder %s1056_s17, 2  ;;  %s711_s21 = sand.u32 1, %s1036_s12  }
 0x23d   : > { %s712_s26 = scalar_lea.sflag [#allocation3], %s711_s21 }
 0x23e   : > { %p894_p1 = pnand %p897_p0, %p1128_p8 }
 0x240   : > { %p895_p2 = pneg %p894_p1 }
 0x242   : > { %1031 = dma.done.wait (%p895_p2), %s712_s26, 2048  }
 0x243   : > { %1033 = vsyncadd (%p895_p2), %s712_s26, 4294965248  ;;  %s16_s17 = sadd.s32 1, %s1056_s17   ;;  %s1421_s12 = smov %s1040_s13 }
 0x244   : > { %p13_p3 = scmp.ge.s32.totalorder %s16_s17, 4   ;;  %s1422_s13 = smov %s1044_s14 }
 0x245   : > { %s1423_s14 = smov %s1134_s25  ;;  %s1424_s15 = smov %s1052_s16 }
 0x246   : > { %s1425_s16 = smov %s1427_s20  ;;  %15 = sbr.rel (!%p13_p3) target bundleno = 4 (0x4), region = 73 }
 0x24b   :  { %717 = vsyncpa [#allocation3], 1 }
 0x24c   :  { %719 = vsyncpa [#allocation3 + $0x1], 1 }

</bundles_post_ra>
